<compile_context>
chip_gen: v6e
topology: v6e:2x2x1
jax: 0.10.0
libtpu: 0.0.40
codegen_flags: <defaults>
</compile_context>

<pallas_src>
import functools

import numpy as np
import jax
import jax.numpy as jnp
from jax.experimental import pallas as pl
from jax.experimental.pallas import tpu as pltpu


def _round_up(x, m):
    return ((x + m - 1) // m) * m


def _split_pad_kernel(ph_ref, meta_ref, out_ref, mask_ref, tokw_ref, tokl_ref,
                      *, mxu_dtype):
    """One (batch-block, T-chunk) grid step.

    ph_ref:   (Bblk, 1, Tt)   f32  phoneme values of this T chunk (T on lanes)
    meta_ref: (Bblk, Wp, 2)   i32  [...,0] = word start (excl. cumsum), [...,1] = word length
    out_ref:  (Bblk, Wp, Lp)  f32  padded words; resident accumulator across T chunks
    mask_ref: (Bblk, Wp, Lp)  i32  nonzero mask of `out`, written at the last chunk
    tokw_ref: (Bblk, 1, Tt)   i32  word index of each nonzero token, -1 otherwise
    tokl_ref: (Bblk, 1, Tt)   i32  within-word position of each nonzero token, -1 otherwise
    """
    t_idx = pl.program_id(1)
    Wp = meta_ref.shape[1]
    Lp = out_ref.shape[2]
    Tt = ph_ref.shape[2]

    @pl.when(t_idx == 0)
    def _init():
        out_ref[...] = jnp.zeros_like(out_ref)
        mask_ref[...] = jnp.zeros_like(mask_ref)

    ph = ph_ref[...]                                    # (Bblk, 1, Tt)  f32
    meta = meta_ref[...]                                # (Bblk, Wp, 2)  i32
    starts = meta[:, :, 0:1]                            # (Bblk, Wp, 1)
    lens = meta[:, :, 1:2]                              # (Bblk, Wp, 1)

    # Global token index for this chunk; broadcasting iota (no 3-D iota materialized).
    t_glob = jax.lax.broadcasted_iota(jnp.int32, (1, 1, Tt), 2) + t_idx * Tt

    # Membership: at[b, w, t] = 1 iff token t belongs to word w.       (Bblk, Wp, Tt)
    at = jnp.logical_and(t_glob >= starts, t_glob < starts + lens)

    # Within-word position / word id per token; bias trick => -1 means "no word"
    # (drops the in_word gate and its extra logical_and / reduce).
    pos = jnp.sum(jnp.where(at, t_glob - starts + 1, 0), axis=1, keepdims=True) - 1   # (Bblk,1,Tt)
    w_iota = jax.lax.broadcasted_iota(jnp.int32, (1, Wp, 1), 1)
    wid = jnp.sum(jnp.where(at, w_iota + 1, 0), axis=1, keepdims=True) - 1            # (Bblk,1,Tt)

    # Per-token (word, position) indices, gated like torch.nonzero (value != 0).
    keep = jnp.logical_and(ph != 0.0, wid >= 0)
    tokw_ref[...] = jnp.where(keep, wid, -1)
    tokl_ref[...] = jnp.where(keep, pos, -1)

    # One-hot over within-word position, T on lanes (broadcasting compares only).
    l_iota = jax.lax.broadcasted_iota(jnp.int32, (1, Lp, 1), 1)
    b_mat = (l_iota == pos).astype(mxu_dtype)                                         # (Bblk,Lp,Tt)

    # Fold phoneme values into the membership matrix; one batched MXU matmul per chunk.
    at_ph = at.astype(mxu_dtype) * ph.astype(mxu_dtype)                               # (Bblk,Wp,Tt)
    out_ref[...] += jax.lax.dot_general(
        at_ph, b_mat,
        dimension_numbers=(((2,), (2,)), ((0,), (0,))),
        preferred_element_type=jnp.float32)

    @pl.when(t_idx == pl.num_programs(1) - 1)
    def _finalize():
        mask_ref[...] = (out_ref[...] != 0.0).astype(jnp.int32)


def portaspeech_positional_encoding(phonemes, word_boundries, *,
                                    block_b=4, block_t=1024,
                                    mxu_dtype=jnp.bfloat16,
                                    vmem_budget_bytes=12 * 1024 * 1024):
    """phonemes: [B, T] float; word_boundries: [B, W] int word lengths (sum == T per row).

    Returns (padded_slab [B_pad, Wp, Lp] f32, mask_slab [B_pad, Wp, Lp] i32,
             ph_idxs [B, T, 2] i32 (-1 filled), (W, L)).
    The slab is lane-dense; slice to [:B, :W, :L] at the consumer.
    """
    phonemes = jnp.asarray(phonemes, jnp.float32)
    word_boundries = jnp.asarray(word_boundries, jnp.int32)
    B, T = phonemes.shape
    W = word_boundries.shape[1]

    # Static max word length (needs concrete boundaries; mirrors torch's dynamic shapes).
    L = int(np.max(np.asarray(word_boundries)))
    Lp = max(128, _round_up(L, 128))          # lane-dense padded-word width

    Wp = _round_up(max(W, 8), 8)              # words on the sublane axis
    T_pad = _round_up(max(T, 128), 128)       # tokens on the lane axis

    # Batch block: keep >= 2 grid steps so both v7x TensorCores (megacore) get work.
    Bblk = max(1, min(int(block_b), (B + 1) // 2))

    # Pick the T chunk / batch block so per-step intermediates stay well under the
    # scoped-VMEM limit on every generation (v5e 16 MiB default, v7x 64 MiB physical).
    def _est(bb, tt):
        # ~6 B/elem for the bf16 one-hot + compare temps, ~8 B/elem membership/at_ph,
        # plus the resident out + mask blocks.
        return bb * (Lp * tt * 6 + Wp * tt * 8 + Wp * Lp * 8)

    Tt = 128
    while Tt * 2 <= min(int(block_t), T_pad) and _est(Bblk, Tt * 2) <= vmem_budget_bytes:
        Tt *= 2
    while Bblk > 1 and _est(Bblk, Tt) > vmem_budget_bytes:
        Bblk //= 2

    T_pad = _round_up(T_pad, Tt)
    B_pad = _round_up(B, Bblk)

    # Padded, kernel-friendly inputs (T multiple of 128 on lanes, W multiple of 8).
    ph_in = jnp.zeros((B_pad, 1, T_pad), jnp.float32).at[:B, 0, :T].set(phonemes)
    starts = jnp.cumsum(word_boundries, axis=1) - word_boundries          # exclusive cumsum
    meta = jnp.stack([starts, word_boundries], axis=-1)                   # (B, W, 2)
    meta_in = jnp.zeros((B_pad, Wp, 2), jnp.int32).at[:B, :W, :].set(meta)

    grid = (B_pad // Bblk, T_pad // Tt)
    kernel = functools.partial(_split_pad_kernel, mxu_dtype=mxu_dtype)

    padded_slab, mask_slab, tokw, tokl = pl.pallas_call(
        kernel,
        grid=grid,
        in_specs=[
            pl.BlockSpec((Bblk, 1, Tt), lambda i, t: (i, 0, t)),
            pl.BlockSpec((Bblk, Wp, 2), lambda i, t: (i, 0, 0)),
        ],
        out_specs=[
            pl.BlockSpec((Bblk, Wp, Lp), lambda i, t: (i, 0, 0)),
            pl.BlockSpec((Bblk, Wp, Lp), lambda i, t: (i, 0, 0)),
            pl.BlockSpec((Bblk, 1, Tt), lambda i, t: (i, 0, t)),
            pl.BlockSpec((Bblk, 1, Tt), lambda i, t: (i, 0, t)),
        ],
        out_shape=[
            jax.ShapeDtypeStruct((B_pad, Wp, Lp), jnp.float32),
            jax.ShapeDtypeStruct((B_pad, Wp, Lp), jnp.int32),
            jax.ShapeDtypeStruct((B_pad, 1, T_pad), jnp.int32),
            jax.ShapeDtypeStruct((B_pad, 1, T_pad), jnp.int32),
        ],
        compiler_params=pltpu.CompilerParams(
            dimension_semantics=("parallel", "arbitrary"),
            vmem_limit_bytes=32 * 1024 * 1024,
        ),
    )(ph_in, meta_in)

    # torch.nonzero emulation: O(B*T) compaction of the per-token indices emitted by the
    # kernel (sequence order == row-major (w, l) order), instead of nonzero over (B, W*L).
    tok_w = tokw[:B, 0, :T]
    tok_l = tokl[:B, 0, :T]
    valid = tok_w >= 0

    def _compact(valid_row, w_row, l_row):
        idx = jnp.nonzero(valid_row, size=T, fill_value=0)[0]
        n = jnp.sum(valid_row.astype(jnp.int32))
        k = jnp.arange(T, dtype=jnp.int32)
        iw = jnp.where(k < n, w_row[idx], -1)
        il = jnp.where(k < n, l_row[idx], -1)
        return iw, il

    iw, il = jax.vmap(_compact)(valid, tok_w, tok_l)
    ph_idxs = jnp.stack([iw, il], axis=-1)                                # (B, T, 2), -1 filled

    return padded_slab, mask_slab, ph_idxs, (W, L)


def _reference_split_pad(phonemes_np, boundaries_np, L):
    B, T = phonemes_np.shape
    W = boundaries_np.shape[1]
    out = np.zeros((B, W, L), np.float32)
    for b in range(B):
        off = 0
        for w in range(W):
            n = int(boundaries_np[b, w])
            out[b, w, :n] = phonemes_np[b, off:off + n]
            off += n
    return out


if __name__ == "__main__":
    key = jax.random.PRNGKey(0)
    B, T, W = 2, 16, 4
    # phoneme token values (0 == padding / silence), deterministic
    phonemes = jax.random.randint(key, (B, T), 0, 10).astype(jnp.float32)
    # per-word phoneme counts; each row sums to T
    word_boundries = jnp.array([[8, 3, 2, 3], [5, 6, 4, 1]], dtype=jnp.int32)

    padded_slab, mask_slab, ph_idxs, (Wr, L) = portaspeech_positional_encoding(
        phonemes, word_boundries)
    jax.block_until_ready((padded_slab, mask_slab, ph_idxs))

    # Slice the lane-dense slab down to the logical (B, W, L) view at the consumer (host).
    slab_np = np.asarray(padded_slab)
    padded = slab_np[:B, :Wr, :L]
    mask = np.asarray(mask_slab)[:B, :Wr, :L]

    # correctness check against a plain numpy reference of pad(split(...))
    ref = _reference_split_pad(np.asarray(phonemes), np.asarray(word_boundries), L)
    np.testing.assert_allclose(padded, ref, atol=0.0)
    np.testing.assert_array_equal(mask, (ref != 0.0).astype(np.int32))

    # padded words / padded positions of the slab must be zero
    assert not slab_np[:B, Wr:, :].any()
    assert not slab_np[:B, :Wr, L:].any()

    # sanity-check ph_idxs against numpy nonzero
    for b in range(B):
        nz = np.stack(np.nonzero(ref[b]), axis=-1)
        got = np.asarray(ph_idxs[b])
        got = got[got[:, 0] >= 0]
        np.testing.assert_array_equal(np.sort(got, axis=0), np.sort(nz, axis=0))

    print("KERNEL_OK")
</pallas_src>

<mosaic_0001>
module attributes {stable_mosaic.version = 11 : i64} {
  func.func @_split_pad_kernel(%arg0: i32, %arg1: i32, %arg2: memref<1x1x128xf32, #tpu.memory_space<vmem>>, %arg3: memref<1x8x2xi32, #tpu.memory_space<vmem>>, %arg4: memref<1x8x128xf32, #tpu.memory_space<vmem>>, %arg5: memref<1x8x128xi32, #tpu.memory_space<vmem>>, %arg6: memref<1x1x128xi32, #tpu.memory_space<vmem>>, %arg7: memref<1x1x128xi32, #tpu.memory_space<vmem>>) attributes {dimension_semantics = [#tpu.dimension_semantics<parallel>, #tpu.dimension_semantics<arbitrary>], iteration_bounds = array<i64: 2, 1>, scalar_prefetch = 0 : i64, scratch_operands = 0 : i64, tpu.core_type = #tpu.core_type<tc>, window_params = [{transform_indices = @transform_0, window_bounds = array<i64: 1, 1, 128>}, {transform_indices = @transform_1, window_bounds = array<i64: 1, 8, 2>}, {transform_indices = @transform_2, window_bounds = array<i64: 1, 8, 128>}, {transform_indices = @transform_3, window_bounds = array<i64: 1, 8, 128>}, {transform_indices = @transform_4, window_bounds = array<i64: 1, 1, 128>}, {transform_indices = @transform_5, window_bounds = array<i64: 1, 1, 128>}]} {
    %c0_i32 = arith.constant 0 : i32
    %0 = arith.cmpi eq, %arg1, %c0_i32 : i32
    %1 = arith.extui %0 : i1 to i32
    %c0_i32_0 = arith.constant 0 : i32
    %2 = arith.cmpi ne, %1, %c0_i32_0 : i32
    scf.if %2 {
      %cst_30 = arith.constant 0.000000e+00 : f32
      %72 = vector.broadcast %cst_30 : f32 to vector<1x8x128xf32>
      %c0_31 = arith.constant 0 : index
      %c0_32 = arith.constant 0 : index
      %c0_33 = arith.constant 0 : index
      %73 = vector.load %arg4[%c0_31, %c0_32, %c0_33] : memref<1x8x128xf32, #tpu.memory_space<vmem>>, vector<1x8x128xf32>
      tpu.vector_store %arg4[%c0_31, %c0_32, %c0_33], %72 {strides = array<i32>} : memref<1x8x128xf32, #tpu.memory_space<vmem>>, vector<1x8x128xf32>,
      %c0_i32_34 = arith.constant 0 : i32
      %74 = vector.broadcast %c0_i32_34 : i32 to vector<1x8x128xi32>
      %c0_35 = arith.constant 0 : index
      %c0_36 = arith.constant 0 : index
      %c0_37 = arith.constant 0 : index
      %75 = vector.load %arg5[%c0_35, %c0_36, %c0_37] : memref<1x8x128xi32, #tpu.memory_space<vmem>>, vector<1x8x128xi32>
      tpu.vector_store %arg5[%c0_35, %c0_36, %c0_37], %74 {strides = array<i32>} : memref<1x8x128xi32, #tpu.memory_space<vmem>>, vector<1x8x128xi32>,
    } else {
    }
    %c0 = arith.constant 0 : index
    %c0_1 = arith.constant 0 : index
    %c0_2 = arith.constant 0 : index
    %3 = vector.load %arg2[%c0, %c0_1, %c0_2] : memref<1x1x128xf32, #tpu.memory_space<vmem>>, vector<1x1x128xf32>
    %c0_3 = arith.constant 0 : index
    %c0_4 = arith.constant 0 : index
    %c0_5 = arith.constant 0 : index
    %4 = vector.load %arg3[%c0_3, %c0_4, %c0_5] : memref<1x8x2xi32, #tpu.memory_space<vmem>>, vector<1x8x2xi32>
    %5 = vector.extract_strided_slice %4 {offsets = [0, 0, 0], sizes = [1, 8, 1], strides = [1, 1, 1]} : vector<1x8x2xi32> to vector<1x8x1xi32>
    %6 = vector.extract_strided_slice %4 {offsets = [0, 0, 1], sizes = [1, 8, 1], strides = [1, 1, 1]} : vector<1x8x2xi32> to vector<1x8x1xi32>
    %7 = tpu.iota {dimensions = array<i32: 2>} : vector<1x1x128xi32>
    %c128_i32 = arith.constant 128 : i32
    %8 = arith.muli %arg1, %c128_i32 : i32
    %9 = vector.broadcast %8 : i32 to vector<1x1x128xi32>
    %10 = arith.addi %7, %9 : vector<1x1x128xi32>
    %11 = vector.broadcast %10 : vector<1x1x128xi32> to vector<1x8x128xi32>
    %12 = vector.broadcast %5 : vector<1x8x1xi32> to vector<1x8x128xi32>
    %13 = arith.cmpi sge, %11, %12 : vector<1x8x128xi32>
    %14 = arith.addi %5, %6 : vector<1x8x1xi32>
    %15 = vector.broadcast %10 : vector<1x1x128xi32> to vector<1x8x128xi32>
    %16 = vector.broadcast %14 : vector<1x8x1xi32> to vector<1x8x128xi32>
    %17 = arith.cmpi slt, %15, %16 : vector<1x8x128xi32>
    %18 = arith.andi %13, %17 : vector<1x8x128xi1>
    %19 = vector.broadcast %10 : vector<1x1x128xi32> to vector<1x8x128xi32>
    %20 = vector.broadcast %5 : vector<1x8x1xi32> to vector<1x8x128xi32>
    %21 = arith.subi %19, %20 : vector<1x8x128xi32>
    %c1_i32 = arith.constant 1 : i32
    %22 = vector.broadcast %c1_i32 : i32 to vector<1x8x128xi32>
    %23 = arith.addi %21, %22 : vector<1x8x128xi32>
    %c0_i32_6 = arith.constant 0 : i32
    %24 = vector.broadcast %c0_i32_6 : i32 to vector<1x8x128xi32>
    %25 = arith.select %18, %23, %24 : vector<1x8x128xi1>, vector<1x8x128xi32>
    %cst = arith.constant dense<0> : vector<1x128xi32>
    %26 = vector.multi_reduction <add>, %25, %cst [1] : vector<1x8x128xi32> to vector<1x128xi32>
    %27 = vector.shape_cast %26 : vector<1x128xi32> to vector<1x1x128xi32>
    %c1_i32_7 = arith.constant 1 : i32
    %28 = vector.broadcast %c1_i32_7 : i32 to vector<1x1x128xi32>
    %29 = arith.subi %27, %28 : vector<1x1x128xi32>
    %30 = tpu.iota {dimensions = array<i32: 1>} : vector<1x8x1xi32>
    %c1_i32_8 = arith.constant 1 : i32
    %31 = vector.broadcast %c1_i32_8 : i32 to vector<1x8x1xi32>
    %32 = arith.addi %30, %31 : vector<1x8x1xi32>
    %c0_i32_9 = arith.constant 0 : i32
    %33 = vector.shape_cast %32 : vector<1x8x1xi32> to vector<1x8x1xi32>
    %34 = vector.broadcast %33 : vector<1x8x1xi32> to vector<1x8x128xi32>
    %35 = vector.broadcast %c0_i32_9 : i32 to vector<1x8x128xi32>
    %36 = arith.select %18, %34, %35 : vector<1x8x128xi1>, vector<1x8x128xi32>
    %cst_10 = arith.constant dense<0> : vector<1x128xi32>
    %37 = vector.multi_reduction <add>, %36, %cst_10 [1] : vector<1x8x128xi32> to vector<1x128xi32>
    %38 = vector.shape_cast %37 : vector<1x128xi32> to vector<1x1x128xi32>
    %c1_i32_11 = arith.constant 1 : i32
    %39 = vector.broadcast %c1_i32_11 : i32 to vector<1x1x128xi32>
    %40 = arith.subi %38, %39 : vector<1x1x128xi32>
    %cst_12 = arith.constant 0.000000e+00 : f32
    %41 = vector.broadcast %cst_12 : f32 to vector<1x1x128xf32>
    %42 = arith.cmpf one, %3, %41 : vector<1x1x128xf32>
    %c0_i32_13 = arith.constant 0 : i32
    %43 = vector.broadcast %c0_i32_13 : i32 to vector<1x1x128xi32>
    %44 = arith.cmpi sge, %40, %43 : vector<1x1x128xi32>
    %45 = arith.andi %42, %44 : vector<1x1x128xi1>
    %c-1_i32 = arith.constant -1 : i32
    %46 = vector.broadcast %c-1_i32 : i32 to vector<1x1x128xi32>
    %47 = arith.select %45, %40, %46 : vector<1x1x128xi1>, vector<1x1x128xi32>
    %c0_14 = arith.constant 0 : index
    %c0_15 = arith.constant 0 : index
    %c0_16 = arith.constant 0 : index
    %48 = vector.load %arg6[%c0_14, %c0_15, %c0_16] : memref<1x1x128xi32, #tpu.memory_space<vmem>>, vector<1x1x128xi32>
    tpu.vector_store %arg6[%c0_14, %c0_15, %c0_16], %47 {strides = array<i32>} : memref<1x1x128xi32, #tpu.memory_space<vmem>>, vector<1x1x128xi32>,
    %c-1_i32_17 = arith.constant -1 : i32
    %49 = vector.broadcast %c-1_i32_17 : i32 to vector<1x1x128xi32>
    %50 = arith.select %45, %29, %49 : vector<1x1x128xi1>, vector<1x1x128xi32>
    %c0_18 = arith.constant 0 : index
    %c0_19 = arith.constant 0 : index
    %c0_20 = arith.constant 0 : index
    %51 = vector.load %arg7[%c0_18, %c0_19, %c0_20] : memref<1x1x128xi32, #tpu.memory_space<vmem>>, vector<1x1x128xi32>
    tpu.vector_store %arg7[%c0_18, %c0_19, %c0_20], %50 {strides = array<i32>} : memref<1x1x128xi32, #tpu.memory_space<vmem>>, vector<1x1x128xi32>,
    %52 = tpu.iota {dimensions = array<i32: 1>} : vector<1x128x1xi32>
    %53 = vector.broadcast %52 : vector<1x128x1xi32> to vector<1x128x128xi32>
    %54 = vector.broadcast %29 : vector<1x1x128xi32> to vector<1x128x128xi32>
    %55 = arith.cmpi eq, %53, %54 : vector<1x128x128xi32>
    %56 = arith.extui %55 : vector<1x128x128xi1> to vector<1x128x128xi32>
    %57 = arith.sitofp %56 : vector<1x128x128xi32> to vector<1x128x128xf32>
    %58 = arith.truncf %57 : vector<1x128x128xf32> to vector<1x128x128xbf16>
    %59 = arith.extui %18 : vector<1x8x128xi1> to vector<1x8x128xi32>
    %60 = arith.sitofp %59 : vector<1x8x128xi32> to vector<1x8x128xf32>
    %61 = arith.truncf %60 : vector<1x8x128xf32> to vector<1x8x128xbf16>
    %62 = arith.truncf %3 : vector<1x1x128xf32> to vector<1x1x128xbf16>
    %63 = vector.broadcast %62 : vector<1x1x128xbf16> to vector<1x8x128xbf16>
    %64 = arith.mulf %61, %63 : vector<1x8x128xbf16>
    %c0_21 = arith.constant 0 : index
    %c0_22 = arith.constant 0 : index
    %c0_23 = arith.constant 0 : index
    %65 = vector.load %arg4[%c0_21, %c0_22, %c0_23] : memref<1x8x128xf32, #tpu.memory_space<vmem>>, vector<1x8x128xf32>
    %cst_24 = arith.constant dense<0.000000e+00> : vector<1x8x128xf32>
    %66 = tpu.matmul %64, %58, %cst_24 {dimension_numbers = #tpu.dot_dimension_numbers<[2], [2], [1], [1], [0, 0, 0, 1, 1, 1], [0], [0]>} : vector<1x8x128xbf16>, vector<1x128x128xbf16>, vector<1x8x128xf32> -> vector<1x8x128xf32>
    %67 = arith.addf %65, %66 : vector<1x8x128xf32>
    %c0_25 = arith.constant 0 : index
    %c0_26 = arith.constant 0 : index
    %c0_27 = arith.constant 0 : index
    %68 = vector.load %arg4[%c0_25, %c0_26, %c0_27] : memref<1x8x128xf32, #tpu.memory_space<vmem>>, vector<1x8x128xf32>
    tpu.vector_store %arg4[%c0_25, %c0_26, %c0_27], %67 {strides = array<i32>} : memref<1x8x128xf32, #tpu.memory_space<vmem>>, vector<1x8x128xf32>,
    %c0_i32_28 = arith.constant 0 : i32
    %69 = arith.cmpi eq, %arg1, %c0_i32_28 : i32
    %70 = arith.extui %69 : i1 to i32
    %c0_i32_29 = arith.constant 0 : i32
    %71 = arith.cmpi ne, %70, %c0_i32_29 : i32
    scf.if %71 {
      %c0_30 = arith.constant 0 : index
      %c0_31 = arith.constant 0 : index
      %c0_32 = arith.constant 0 : index
      %72 = vector.load %arg4[%c0_30, %c0_31, %c0_32] : memref<1x8x128xf32, #tpu.memory_space<vmem>>, vector<1x8x128xf32>
      %cst_33 = arith.constant 0.000000e+00 : f32
      %73 = vector.broadcast %cst_33 : f32 to vector<1x8x128xf32>
      %74 = arith.cmpf one, %72, %73 : vector<1x8x128xf32>
      %75 = arith.extui %74 : vector<1x8x128xi1> to vector<1x8x128xi32>
      %c0_34 = arith.constant 0 : index
      %c0_35 = arith.constant 0 : index
      %c0_36 = arith.constant 0 : index
      %76 = vector.load %arg5[%c0_34, %c0_35, %c0_36] : memref<1x8x128xi32, #tpu.memory_space<vmem>>, vector<1x8x128xi32>
      tpu.vector_store %arg5[%c0_34, %c0_35, %c0_36], %75 {strides = array<i32>} : memref<1x8x128xi32, #tpu.memory_space<vmem>>, vector<1x8x128xi32>,
    } else {
    }
    return
  }
  func.func @transform_0(%arg0: i32, %arg1: i32) -> (i32, i32, i32) {
    %c0_i32 = arith.constant 0 : i32
    %c0_i32_0 = arith.constant 0 : i32
    return %arg0, %c0_i32, %arg1 : i32, i32, i32
  }
  func.func @transform_1(%arg0: i32, %arg1: i32) -> (i32, i32, i32) {
    %c0_i32 = arith.constant 0 : i32
    %c0_i32_0 = arith.constant 0 : i32
    %c0_i32_1 = arith.constant 0 : i32
    return %arg0, %c0_i32, %c0_i32_0 : i32, i32, i32
  }
  func.func @transform_2(%arg0: i32, %arg1: i32) -> (i32, i32, i32) {
    %c0_i32 = arith.constant 0 : i32
    %c0_i32_0 = arith.constant 0 : i32
    %c0_i32_1 = arith.constant 0 : i32
    return %arg0, %c0_i32, %c0_i32_0 : i32, i32, i32
  }
  func.func @transform_3(%arg0: i32, %arg1: i32) -> (i32, i32, i32) {
    %c0_i32 = arith.constant 0 : i32
    %c0_i32_0 = arith.constant 0 : i32
    %c0_i32_1 = arith.constant 0 : i32
    return %arg0, %c0_i32, %c0_i32_0 : i32, i32, i32
  }
  func.func @transform_4(%arg0: i32, %arg1: i32) -> (i32, i32, i32) {
    %c0_i32 = arith.constant 0 : i32
    %c0_i32_0 = arith.constant 0 : i32
    return %arg0, %c0_i32, %arg1 : i32, i32, i32
  }
  func.func @transform_5(%arg0: i32, %arg1: i32) -> (i32, i32, i32) {
    %c0_i32 = arith.constant 0 : i32
    %c0_i32_0 = arith.constant 0 : i32
    return %arg0, %c0_i32, %arg1 : i32, i32, i32
  }
}

</mosaic_0001>

<bundles_post_ra>
// kernel: tpu_custom_call.1
= control target key start
LH: loop header
LB: loop body
LE: loop exit
PB: predicated region body
PF: predicated region fallthrough
CT: control target
= control target key end

     0   :  { %s1345_s0 = inlined_call_operand.vmem [shape: f32[2,1,128], index: 0, kind: input, shape index: {}]   ;;  %s1346_s1 = inlined_call_operand.vmem [shape: s32[2,8,2], index: 1, kind: input, shape index: {}]   ;;  %s1347_s2 = inlined_call_operand.hbm [shape: f32[2,8,128], index: 2, kind: output, shape index: {0}]   ;;  %s1348_s3 = inlined_call_operand.hbm [shape: s32[2,8,128], index: 3, kind: output, shape index: {1}]   ;;  %s1349_s4 = inlined_call_operand.hbm [shape: s32[2,1,128], index: 4, kind: output, shape index: {2}]   ;;  %s1350_s5 = inlined_call_operand.hbm [shape: s32[2,1,128], index: 5, kind: output, shape index: {3}]  }
   0x1   :  { %1354 = sst [smem:[#allocation12_spill]] %s1345_s0 }
   0x2   :  { %1355 = sst [smem:[#allocation13_spill]] %s1346_s1 }
   0x3   :  { %11 = vsyncpa [#allocation3], 0 }
   0x4   :  { %13 = vsyncpa [#allocation3 + $0x1], 0 }
   0x5   :  { %14 = vsyncpa [#allocation5], 0 }
   0x6   :  { %16 = vsyncpa [#allocation5 + $0x1], 0 }
   0x7   :  { %17 = vsyncpa [#allocation8], 0 }
   0x8   :  { %19 = vsyncpa [#allocation8 + $0x1], 0  ;;  %s1068_s18 = smov 0   ;;  %s1070_s19 = smov 0  }
   0x9   :  { %s1072_s20 = smov 0   ;;  %s1074_s21 = smov 0  }
   0xa   :  { %s1076_s22 = smov 0   ;;  %s1078_s23 = smov 0  }
   0xb LB: > { %s708_s24 = sadd.s32 4294967295, %s1027_s23   ;;  %s1351_s25 = sadd.s32 4294967294, %s1027_s23   ;;  %s1027_s23 = sphi %s1078_s23, %s25_s23   ;;  %s1023_s22 = sphi %s1076_s22, %s1367_s22   ;;  %s1019_s21 = sphi %s1074_s21, %s1366_s21   ;;  %s1015_s20 = sphi %s1072_s20, %s1365_s20   ;;  %s1011_s19 = sphi %s1070_s19, %s1364_s19   ;;  %s1007_s18 = sphi %s1068_s18, %s1363_s18  }
   0xc   : > { %s37_s26 = sadd.s32 1, %s1023_s22  ;;  %s98_s27 = sadd.s32 1, %s1015_s20 }
   0xd   : > { %p39_p0 = scmp.ge.s32.totalorder %s37_s26, 2  ;;  %p108_p1 = scmp.ne.s32.totalorder %s1015_s20, %s1011_s19 }
   0xe   : > { %p109_p2 = scmp.eq.s32.totalorder %s708_s24, 1  ;;  %p114_p3 = scmp.ne.s32.totalorder %s1011_s19, %s1007_s18 }
   0xf   : > { %s1369_s26 = smov (%p39_p0, %s37_s26), 0  ;;  %p115_p5 = scmp.eq.s32.totalorder %s1351_s25, 1 }
  0x10   : > { %p1110_p4 = por %p109_p2, %p108_p1  ;;  %s95_s29 = ssub.s32 %s1023_s22, %s1369_s26 }
  0x11   : > { %p712_p6 = scmp.ge.s32.totalorder %s1027_s23, 1  ;;  %p96_p7 = scmp.eq.s32.totalorder %s95_s29, 0 }
  0x12   : > { %p1119_p8 = por %p115_p5, %p114_p3  ;;  %p231_p9 = scmp.lt.s32.totalorder %s1027_s23, 3 }
  0x13   : > { %s1125_s6 = scalar_select %p96_p7, %s1015_s20, %s98_s27  }
  0x14   : > { %p232_p10 = pnand %p712_p6, %p231_p9 }
  0x15   : > { %p277_p11 = scmp.lt.s32.totalorder (!%p232_p10), %s1019_s21, 1  ;;  %s1358_s1 = sld [smem:[#allocation13_spill]] (!%p232_p10) }
  0x16   : > { %235 = sbr.rel (%p232_p10) target bundleno = 611 (0x263), region = 28  ;;  %s1030_s12 = smov (!%p232_p10), 127  }
  0x17   : > { %s1359_s0 = sld [smem:[#allocation12_spill]] (!%p232_p10)  ;;  %s1158_s16 = sand.u32 (!%p232_p10), 1, %s1011_s19  }
  0x18   : > { %s1353_s17 = scalar_lea.vmem (!%p232_p10), [#allocation6], %s1158_s16  ;;  %s276_s27 = scalar_lea.vmem (!%p232_p10), [#allocation7], %s1158_s16 }
  0x19   : > { %s1352_s29 = sshll.u32 (!%p232_p10), %s1019_s21, 4  ;;  %s542_s10 = sshll.u32 (!%p232_p10), %s276_s27, 4  ;;  %s543_s10 = int_to_ptr.vmem [resolvable:$true] %s542_s10 }
  0x1a   : > { %s540_s9 = scalar_lea.hbm (!%p232_p10), %s1350_s5, %s1352_s29  ;;  %s1034_s13 = smov (!%p232_p10), [#allocation7]  }
  0x1b   : > { %v1029_v0 = vmov 0   ;;  %s278_s7 = scalar_select %p277_p11, %s1019_s21, 1  ;;  %v1031_v2 = vmov 0.0   ;;  %vm1032_vm0 = vmmov 0   ;;  %v296_v5 = vlaneseq }
  0x1c   : > { %863 = vset.pattern.permute.xlu0 %v1029_v0  ;;  %864 = vset.pattern.permute.xlu1 %v1029_v0  ;;  %v1033_v40 = vmov 1.0|1.0   ;;  %s869_s14 = sshll.u32 %s1034_s13, 4  ;;  %s870_s14 = int_to_ptr.vmem [resolvable:$false] %s869_s14 }
  0x1d   : > { %s715_s8 = sshll.u32 %s278_s7, 3  ;;  %768 = vmatprep.subr.bf16.mxu0 %v1031_v2  ;;  %784 = vmatprep.mubr.msk.bf16.mxu0 %vm1032_vm0, %v1031_v2  ;;  %s282_s15 = scalar_lea.vmem %s1359_s0, %s278_s7  ;;  %v297_v7 = vand.u32 127, %v296_v5  ;;  %v1139_v10 = vshrl.u32 %v296_v5, 7 }
  0x1e   : > { %s286_s11 = scalar_lea.vmem %s1358_s1, %s715_s8  ;;  %v294_v6 = vld [vmem:[%s282_s15] sm:$0x1]  ;;  %s871_s15 = scalar_lea.vmem %s870_s14, 32 }
  0x1f   : > { %v295_v1 = vld [vmem:[%s286_s11] sm:$0xff]  ;;  %v415_v9 = vpack.c.bf16 %v294_v6, %v294_v6  ;;  %v421_v13 = vsub.s32 0, %v1139_v10  ;;  %v325_v15 = vadd.s32 1, %v1139_v10  ;;  %v354_v34 = vadd.s32 112, %v1139_v10  ;;  %s489_s11 = scalar_lea.sflag [#allocation8], %s1158_s16  ;;  %p872_p1 = scmp.lt.s32.totalorder %s543_s10, %s870_s14 }
  0x20   : > { %305 = vrot.lane.b32.xlu0 %v295_v1, %s1030_s12  ;;  %v355_v35 = vadd.s32 120, %v1139_v10  ;;  %v352_v38 = vadd.s32 96, %v1139_v10  ;;  %v353_v39 = vadd.s32 104, %v1139_v10  ;;  %vm334_vm9 = vcmp.ne.f32.partialorder %v294_v6, 0.0  ;;  %s865_s12 = scalar_lea.vmem %s543_s10, 16 }
  0x21   : > { %v417_v12 = vpack.i.b16 %v415_v9, %v415_v9  ;;  %v350_v42 = vadd.s32 80, %v1139_v10  ;;  %v351_v43 = vadd.s32 88, %v1139_v10  ;;  %v348_v46 = vadd.s32 64, %v1139_v10  ;;  %p866_p12 = scmp.ne.s32.totalorder %s543_s10, %s865_s12  ;;  %p873_p2 = scmp.lt.s32.totalorder %s871_s15, %s865_s12 }
  0x22   : > { %v349_v47 = vadd.s32 72, %v1139_v10  ;;  %v346_v48 = vadd.s32 48, %v1139_v10  ;;  %v347_v49 = vadd.s32 56, %v1139_v10  ;;  %v344_v50 = vadd.s32 32, %v1139_v10 }
  0x23   : > { %v422_v17 = vrot.slane %v417_v12, %v421_v13  ;;  %v345_v51 = vadd.s32 40, %v1139_v10  ;;  %v342_v52 = vadd.s32 16, %v1139_v10  ;;  %v343_v53 = vadd.s32 24, %v1139_v10  ;;  %p867_p13 = pnand %p866_p12, %p1110_p4  ;;  %p874_p3 = por %p873_p2, %p872_p1 }
  0x24   : > { %302 = vperm.xlu0 %863, %v295_v1   ;;  %v341_v54 = vadd.s32 8, %v1139_v10 }
  0x25   : > { %p868_p0 = pneg %p867_p13 }
  0x27   : > { %p875_p5 = pnand %p874_p3, %p868_p0 }
  0x92   : > { %v306_v3 = vpop.permute.xlu0 %305 }
  0x93   : > { %v307_v4 = vadd.s32 %v306_v3, %v295_v1 }
  0x95   : > { %309 = vperm.xlu1 %864, %v307_v4  }
  0x9f   : > { %v303_v8 = vpop.permute.xlu0 %302 }
  0xa0   : > { %v313_v11 = vsub.s32 %v297_v7, %v303_v8  ;;  %vm304_vm1 = vcmp.ge.s32.totalorder %v297_v7, %v303_v8 }
  0xa2   : > { %v314_v14 = vadd.s32 1, %v313_v11 }
 0x110   : > { %v310_v16 = vpop.permute.xlu1 %309 }
 0x111   : > { %vm311_vm2 = vcmp.lt.s32.totalorder %v297_v7, %v310_v16 }
 0x112   : > { %vm312_vm3 = vmand %vm304_vm1, %vm311_vm2 }
 0x113   : > { %v315_v18 = vsel %vm312_vm3, %v314_v14, 0  ;;  %v326_v19 = vsel %vm312_vm3, %v325_v15, 0  ;;  %v734_v20 = vsel %vm312_vm3, 1.0, %v1031_v2 }
 0x114   : > { %v316_v21 = vrot.slane %v315_v18, 4  ;;  %v327_v22 = vrot.slane %v326_v19, 4  ;;  %v414_v23 = vpack.c.bf16 %v734_v20, %v734_v20 }
 0x116   : > { %v317_v24 = vadd.s32 %v316_v21, %v315_v18  ;;  %v328_v25 = vadd.s32 %v327_v22, %v326_v19  ;;  %v1144_v26 = vmul.bf16 %v422_v17, %v414_v23 }
 0x118   : > { %v318_v27 = vrot.slane %v317_v24, 2  ;;  %v329_v28 = vrot.slane %v328_v25, 2 }
 0x11a   : > { %v319_v29 = vadd.s32 %v318_v27, %v317_v24  ;;  %v330_v30 = vadd.s32 %v329_v28, %v328_v25 }
 0x11c   : > { %v320_v31 = vrot.slane %v319_v29, 1  ;;  %v331_v32 = vrot.slane %v330_v30, 1 }
 0x11e   : > { %v321_v33 = vadd.s32 %v320_v31, %v319_v29  ;;  %v332_v37 = vadd.s32 %v331_v32, %v330_v30 }
 0x120   : > { %v1148_v36 = vadd.s32 4294967295, %v321_v33  ;;  %v717_v41 = vadd.s32 4294967295, %v332_v37 }
 0x122   : > { %vm370_vm4 = vcmp.eq.s32.totalorder %v354_v34, %v1148_v36  ;;  %vm371_vm5 = vcmp.eq.s32.totalorder %v355_v35, %v1148_v36  ;;  %vm368_vm7 = vcmp.eq.s32.totalorder %v352_v38, %v1148_v36  ;;  %vm369_vm8 = vcmp.eq.s32.totalorder %v353_v39, %v1148_v36 }
 0x123   : > { %vm735_vm6 = vmpackc.low %vm371_vm5, %vm370_vm4  ;;  %vm335_vm10 = vcmp.ge.s32.totalorder %v717_v41, 0  ;;  %vm366_vm13 = vcmp.eq.s32.totalorder %v350_v42, %v1148_v36  ;;  %vm367_vm14 = vcmp.eq.s32.totalorder %v351_v43, %v1148_v36  ;;  %vm364_vm0 = vcmp.eq.s32.totalorder %v348_v46, %v1148_v36 }
 0x124   : > { %769 = vmatpush3.bf16.xpose.msk.msra.mxu0 %vm735_vm6, %v1033_v40  ;;  %vm737_vm11 = vmpackc.low %vm369_vm8, %vm368_vm7  ;;  %vm365_vm1 = vcmp.eq.s32.totalorder %v349_v47, %v1148_v36  ;;  %vm362_vm3 = vcmp.eq.s32.totalorder %v346_v48, %v1148_v36  ;;  %vm363_vm4 = vcmp.eq.s32.totalorder %v347_v49, %v1148_v36  ;;  %vm360_vm6 = vcmp.eq.s32.totalorder %v344_v50, %v1148_v36 }
 0x125   : > { %770 = vmatprep.subr.bf16.mxu0 %v1031_v2  ;;  %vm336_vm12 = vmand %vm334_vm9, %vm335_vm10  ;;  %vm361_vm7 = vcmp.eq.s32.totalorder %v345_v51, %v1148_v36  ;;  %vm358_vm9 = vcmp.eq.s32.totalorder %v342_v52, %v1148_v36  ;;  %vm359_vm10 = vcmp.eq.s32.totalorder %v343_v53, %v1148_v36 }
 0x126   : > { %v337_v44 = vsel %vm336_vm12, %v717_v41, 4294967295  ;;  %v339_v45 = vsel %vm336_vm12, %v1148_v36, 4294967295  ;;  %vm739_vm15 = vmpackc.low %vm367_vm14, %vm366_vm13  ;;  %vm356_vm12 = vcmp.eq.s32.totalorder %v1139_v10, %v1148_v36  ;;  %vm357_vm13 = vcmp.eq.s32.totalorder %v341_v54, %v1148_v36 }
 0x127   : > { %338 = vst [vmem:[%s1353_s17] sm:$0x1] %v337_v44  ;;  %340 = vst [vmem:[%s276_s27] sm:$0x1] %v339_v45 }
 0x128   : > { %vm741_vm2 = vmpackc.low %vm365_vm1, %vm364_vm0 }
 0x129   : > { %vm743_vm5 = vmpackc.low %vm363_vm4, %vm362_vm3 }
 0x12a   : > { %vm745_vm8 = vmpackc.low %vm361_vm7, %vm360_vm6 }
 0x12b   : > { %vm749_vm14 = vmpackc.low %vm357_vm13, %vm356_vm12 }
 0x12c   : > { %771 = vmatpush3.bf16.xpose.msk.msra.mxu0 %vm737_vm11, %v1033_v40  ;;  %vm747_vm11 = vmpackc.low %vm359_vm10, %vm358_vm9 }
 0x12d   : > { %772 = vmatprep.subr.bf16.mxu0 %v1031_v2 }
 0x134   : > { %773 = vmatpush3.bf16.xpose.msk.msra.mxu0 %vm739_vm15, %v1033_v40 }
 0x135   : > { %774 = vmatprep.subr.bf16.mxu0 %v1031_v2 }
 0x13c   : > { %775 = vmatpush3.bf16.xpose.msk.msra.mxu0 %vm741_vm2, %v1033_v40 }
 0x13d   : > { %776 = vmatprep.subr.bf16.mxu0 %v1031_v2 }
 0x144   : > { %777 = vmatpush3.bf16.xpose.msk.msra.mxu0 %vm743_vm5, %v1033_v40 }
 0x145   : > { %778 = vmatprep.subr.bf16.mxu0 %v1031_v2 }
 0x14c   : > { %779 = vmatpush3.bf16.xpose.msk.msra.mxu0 %vm745_vm8, %v1033_v40 }
 0x14d   : > { %780 = vmatprep.subr.bf16.mxu0 %v1031_v2 }
 0x154   : > { %781 = vmatpush3.bf16.xpose.msk.msra.mxu0 %vm747_vm11, %v1033_v40 }
 0x155   : > { %782 = vmatprep.subr.bf16.mxu0 %v1031_v2 }
 0x15c   : > { %783 = vmatpush3.bf16.xpose.msk.msra.mxu0 %vm749_vm14, %v1033_v40 }
 0x163   : > { %785 = vmatmul.mubr.bf16.vlgmr.msra.gmra.mxu0 %v1144_v26 }
 0x164   : > { %878 = shalt.err (!%p875_p5)
}
 0x165   : > { %s879_s7 = scalar_lea.hbm %s540_s9, 16  ;;  %s883_s25 = scalar_lea.hbm %s1350_s5, 32 }
 0x166   : > { %p880_p6 = scmp.ne.s32.totalorder %s540_s9, %s879_s7  ;;  %p884_p10 = scmp.lt.s32.totalorder %s540_s9, %s1350_s5 }
 0x167   : > { %p885_p11 = scmp.lt.s32.totalorder %s883_s25, %s879_s7 }
 0x168   : > { %p881_p7 = pnand %p880_p6, %p1110_p4 }
 0x169   : > { %p886_p12 = por %p885_p11, %p884_p10 }
 0x16a   : > { %p882_p9 = pneg %p881_p7 }
 0x16c   : > { %p887_p13 = pnand %p886_p12, %p882_p9 }
 0x16e   : > { %890 = shalt.err (!%p887_p13)
}
 0x16f   : > { %791 = dma.vmem_to_hbm [thread:$0]  (%p1110_p4), %s543_s10, 16, %s540_s9, %s489_s11  }
 0x170   : > { %s713_s12 = sshll.u32 %s1158_s16, 3  ;;  %s1222_s13 = sand.u32 1, %s708_s24  }
 0x171   : > { %s753_s14 = sshll.u32 %s1019_s21, 7  ;;  %s257_s15 = scalar_lea.vmem [#allocation2], %s713_s12 }
 0x172   : > { %s501_s17 = sshll.u32 %s257_s15, 4  ;;  %s1225_s25 = scalar_lea.vmem [#allocation4], %s713_s12  ;;  %s1235_s17 = int_to_ptr.vmem [resolvable:$true] %s501_s17 }
 0x173   : > { %s514_s29 = sshll.u32 %s1225_s25, 4  ;;  %s1360_s7 = scalar_lea.vmem [#allocation6], %s1158_s16  ;;  %s1242_s29 = int_to_ptr.vmem [resolvable:$true] %s514_s29 }
 0x174   : > { %s528_s27 = sshll.u32 %s1360_s7, 4  ;;  %s1233_s9 = scalar_lea.hbm %s1347_s2, %s753_s14  ;;  %s1251_s27 = int_to_ptr.vmem [resolvable:$true] %s528_s27 }
 0x175   : > { %s1240_s11 = scalar_lea.hbm %s1348_s3, %s753_s14  ;;  %s1361_s12 = sshll.u32 %s1019_s21, 4 }
 0x176   : > { %s1249_s8 = scalar_lea.hbm %s1349_s4, %s1361_s12  ;;  %s475_s1 = scalar_lea.sflag [#allocation3], %s1158_s16 }
 0x177   : > { %s891_s24 = scalar_lea.vmem %s1235_s17, 128  ;;  %s1035_s14 = smov [#allocation2]  }
 0x178   : > { %p892_p0 = scmp.ne.s32.totalorder %s1235_s17, %s891_s24 }
 0x17a   : > { %p893_p1 = pnand %p892_p0, %p1110_p4 }
 0x17c   : > { %p894_p2 = pneg %p893_p1 }
 0x223   : > { %v459_v55 = vpop.f32.mrf.mxu0 }
 0x224   : > { %466 = vst [vmem:[%s257_s15] sm:$0xff] %v459_v55  ;;  %vm471_vm15 = vcmp.ne.f32.partialorder %v459_v55, 0.0  ;;  %s895_s15 = sshll.u32 %s1035_s14, 4  ;;  %s896_s15 = int_to_ptr.vmem [resolvable:$false] %s895_s15 }
 0x225   : > { %v786_v56 = vpop.f32.mrf.mxu0  ;;  %v472_v58 = vsel %vm471_vm15, 1, %v1029_v0  ;;  %s897_s21 = scalar_lea.vmem %s896_s15, 256  ;;  %p898_p3 = scmp.lt.s32.totalorder %s1235_s17, %s896_s15 }
 0x226   : > { %p899_p5 = scmp.lt.s32.totalorder %s897_s21, %s891_s24 }
 0x227   : > { %v462_v57 = vpop.f32.mrf.mxu0 }
 0x228   : > { %p900_p6 = por %p899_p5, %p898_p3 }
 0x22a   : > { %p901_p7 = pnand %p900_p6, %p894_p2 }
 0x22c   : > { %904 = shalt.err (!%p901_p7)
}
 0x22d   : > { %s905_s10 = scalar_lea.hbm %s1233_s9, 128  ;;  %s909_s7 = scalar_lea.hbm %s1347_s2, 256 }
 0x22e   : > { %p906_p9 = scmp.ne.s32.totalorder %s1233_s9, %s905_s10  ;;  %p910_p12 = scmp.lt.s32.totalorder %s1233_s9, %s1347_s2 }
 0x22f   : > { %p911_p13 = scmp.lt.s32.totalorder %s909_s7, %s905_s10 }
 0x230   : > { %p907_p10 = pnand %p906_p9, %p1110_p4 }
 0x231   : > { %p912_p0 = por %p911_p13, %p910_p12 }
 0x232   : > { %p908_p11 = pneg %p907_p10 }
 0x234   : > { %p913_p1 = pnand %p912_p0, %p908_p11 }
 0x236   : > { %916 = shalt.err (!%p913_p1)
}
 0x237   : > { %788 = dma.vmem_to_hbm [thread:$0]  (%p1110_p4), %s1235_s17, 128, %s1233_s9, %s475_s1   ;;  %473 = vst [vmem:[%s1225_s25] sm:$0xff] %v472_v58  ;;  %v787_v59 = vpop.f32.mrf.mxu0 }
 0x238   : > { %s480_s24 = scalar_lea.sflag [#allocation5], %s1222_s13  ;;  %s917_s15 = scalar_lea.vmem %s1242_s29, 128 }
 0x239   : > { %p918_p2 = scmp.ne.s32.totalorder %s1242_s29, %s917_s15  ;;  %s1036_s21 = smov [#allocation4]  }
 0x23a   : > { %s921_s10 = sshll.u32 %s1036_s21, 4  ;;  %s922_s10 = int_to_ptr.vmem [resolvable:$false] %s921_s10 }
 0x23b   : > { %p919_p3 = pnand %p918_p2, %p1110_p4  ;;  %s923_s16 = scalar_lea.vmem %s922_s10, 256 }
 0x23c   : > { %p924_p6 = scmp.lt.s32.totalorder %s1242_s29, %s922_s10  ;;  %p925_p7 = scmp.lt.s32.totalorder %s923_s16, %s917_s15 }
 0x23d   : > { %p920_p5 = pneg %p919_p3 }
 0x23e   : > { %p926_p9 = por %p925_p7, %p924_p6 }
 0x240   : > { %p927_p10 = pnand %p926_p9, %p920_p5 }
 0x242   : > { %930 = shalt.err (!%p927_p10)
}
 0x243   : > { %s931_s1 = scalar_lea.hbm %s1240_s11, 128  ;;  %s935_s9 = scalar_lea.hbm %s1348_s3, 256 }
 0x244   : > { %p932_p11 = scmp.ne.s32.totalorder %s1240_s11, %s931_s1  ;;  %p936_p0 = scmp.lt.s32.totalorder %s1240_s11, %s1348_s3 }
 0x245   : > { %p937_p1 = scmp.lt.s32.totalorder %s935_s9, %s931_s1 }
 0x246   : > { %p933_p12 = pnand %p932_p11, %p1110_p4 }
 0x247   : > { %p938_p2 = por %p937_p1, %p936_p0 }
 0x248   : > { %p934_p13 = pneg %p933_p12 }
 0x24a   : > { %p939_p3 = pnand %p938_p2, %p934_p13 }
 0x24c   : > { %942 = shalt.err (!%p939_p3)
}
 0x24d   : > { %789 = dma.vmem_to_hbm [thread:$0]  (%p1110_p4), %s1242_s29, 128, %s1240_s11, %s480_s24  }
 0x24e   : > { %s943_s0 = scalar_lea.vmem %s1251_s27, 16  ;;  %s1037_s14 = smov [#allocation6]  }
 0x24f   : > { %p944_p5 = scmp.ne.s32.totalorder %s1251_s27, %s943_s0  ;;  %s947_s15 = sshll.u32 %s1037_s14, 4  ;;  %s948_s15 = int_to_ptr.vmem [resolvable:$false] %s947_s15 }
 0x250   : > { %s949_s21 = scalar_lea.vmem %s948_s15, 32  ;;  %p950_p9 = scmp.lt.s32.totalorder %s1251_s27, %s948_s15 }
 0x251   : > { %p945_p6 = pnand %p944_p5, %p1110_p4  ;;  %p951_p10 = scmp.lt.s32.totalorder %s949_s21, %s943_s0 }
 0x253   : > { %p946_p7 = pneg %p945_p6  ;;  %p952_p11 = por %p951_p10, %p950_p9 }
 0x255   : > { %p953_p12 = pnand %p952_p11, %p946_p7 }
 0x257   : > { %956 = shalt.err (!%p953_p12)
}
 0x258   : > { %s957_s10 = scalar_lea.hbm %s1249_s8, 16  ;;  %s961_s16 = scalar_lea.hbm %s1349_s4, 32 }
 0x259   : > { %p958_p13 = scmp.ne.s32.totalorder %s1249_s8, %s957_s10  ;;  %p962_p2 = scmp.lt.s32.totalorder %s1249_s8, %s1349_s4 }
 0x25a   : > { %p963_p3 = scmp.lt.s32.totalorder %s961_s16, %s957_s10 }
 0x25b   : > { %p959_p0 = pnand %p958_p13, %p1110_p4 }
 0x25c   : > { %p964_p5 = por %p963_p3, %p962_p2 }
 0x25d   : > { %p960_p1 = pneg %p959_p0 }
 0x25f   : > { %p965_p6 = pnand %p964_p5, %p960_p1 }
 0x261   : > { %968 = shalt.err (!%p965_p6)
}
 0x262   : > { %790 = dma.vmem_to_hbm [thread:$0]  (%p1110_p4), %s1251_s27, 16, %s1249_s8, %s480_s24  }
 0x263 PF: > { %p809_p7 = scmp.ge.s32.totalorder %s1027_s23, 2  ;;  %s554_s25 = sand.u32 1, %s1007_s18  }
 0x264   : > { %s555_s9 = scalar_lea.sflag [#allocation3], %s554_s25 }
 0x265   : > { %p797_p9 = pnand %p809_p7, %p1119_p8 }
 0x267   : > { %p798_p10 = pneg %p797_p9 }
 0x269   : > { %994 = dma.done.wait (%p798_p10), %s555_s9, 128  }
 0x26a   : > { %996 = vsyncadd (%p798_p10), %s555_s9, 4294967168  ;;  %s1362_s12 = sadd.s32 4294967294, %s1027_s23  }
 0x26b   : > { %s563_s28 = sand.u32 1, %s1362_s12  }
 0x26c   : > { %s564_s7 = scalar_lea.sflag [#allocation5], %s563_s28 }
 0x26d   : > { %998 = dma.done.wait (%p798_p10), %s564_s7, 144  }
 0x26e   : > { %1000 = vsyncadd (%p798_p10), %s564_s7, 4294967152  ;;  %s581_s13 = scalar_lea.sflag [#allocation8], %s554_s25 }
 0x26f   : > { %1002 = dma.done.wait (%p798_p10), %s581_s13, 16  }
 0x270   : > { %1004 = vsyncadd (%p798_p10), %s581_s13, 4294967280  ;;  %s25_s23 = sadd.s32 1, %s1027_s23   ;;  %s1363_s18 = smov %s1011_s19 }
 0x271   : > { %p22_p4 = scmp.ge.s32.totalorder %s25_s23, 4   ;;  %s1364_s19 = smov %s1015_s20 }
 0x272   : > { %s1365_s20 = smov %s1125_s6  ;;  %s1366_s21 = smov %s1023_s22 }
 0x273   : > { %s1367_s22 = smov %s1369_s26  ;;  %24 = sbr.rel (!%p22_p4) target bundleno = 11 (0xb), region = 123 }
 0x278   :  { %585 = vsyncpa [#allocation3], 1 }
 0x279   :  { %587 = vsyncpa [#allocation3 + $0x1], 1 }
 0x27a   :  { %588 = vsyncpa [#allocation5], 1 }
 0x27b   :  { %590 = vsyncpa [#allocation5 + $0x1], 1 }
 0x27c   :  { %591 = vsyncpa [#allocation8], 1 }
 0x27d   :  { %593 = vsyncpa [#allocation8 + $0x1], 1 }

</bundles_post_ra>
